<compile_context>
chip_gen: v5e
topology: v5e:2x2
jax: 0.10.0
libtpu: 0.0.40
codegen_flags: <defaults>
</compile_context>

<pallas_src>
import jax
import jax.numpy as jnp
from jax.experimental import pallas as pl
from jax.experimental.pallas import tpu as pltpu


# ---------------------------- kernels ----------------------------------------

def _ffn_kernel_acc_in_out(x_ref, w1_ref, b1_ref, w2_ref, b2_ref, o_ref):
    """f32 output: accumulate directly in o_ref (its block index is constant
    along k), saving the tm*d_model*4 f32 scratch."""
    k = pl.program_id(1)

    @pl.when(k == 0)
    def _():
        o_ref[...] = jnp.zeros_like(o_ref)

    # Linear(d_model -> tk slice of d_ff) + bias + ReLU (f32 accumulation on MXU).
    h = jnp.dot(x_ref[...], w1_ref[...], preferred_element_type=jnp.float32)
    h = jnp.maximum(h + b1_ref[...], 0.0)
    # Dropout(p) in eval mode == identity.

    # Partial Linear(tk slice of d_ff -> d_model); accumulate in the f32 output block.
    o_ref[...] += jnp.dot(h.astype(w2_ref.dtype), w2_ref[...],
                          preferred_element_type=jnp.float32)

    @pl.when(k == pl.num_programs(1) - 1)
    def _():
        o_ref[...] += b2_ref[...]


def _ffn_kernel_scratch(x_ref, w1_ref, b1_ref, w2_ref, b2_ref, o_ref, acc_ref):
    """Non-f32 output: accumulate in an f32 VMEM scratch, cast on finalize."""
    k = pl.program_id(1)

    @pl.when(k == 0)
    def _():
        acc_ref[...] = jnp.zeros_like(acc_ref)

    h = jnp.dot(x_ref[...], w1_ref[...], preferred_element_type=jnp.float32)
    h = jnp.maximum(h + b1_ref[...], 0.0)
    # Dropout(p) in eval mode == identity.
    acc_ref[...] += jnp.dot(h.astype(w2_ref.dtype), w2_ref[...],
                            preferred_element_type=jnp.float32)

    @pl.when(k == pl.num_programs(1) - 1)
    def _():
        o_ref[...] = (acc_ref[...] + b2_ref[...]).astype(o_ref.dtype)


# ---------------------------- helpers -----------------------------------------

def _round_up(x, m):
    return ((x + m - 1) // m) * m


def _vmem_budget_bytes():
    """~80% of physical VMEM (leaves headroom for compiler-internal scratch)."""
    try:
        cap = pltpu.get_tpu_info().vmem_capacity_bytes
    except Exception:
        cap = 64 * 1024 * 1024  # conservative (v7x-sized) fallback
    return int(cap * 0.8)


def _est_vmem_bytes(tm, tk, d_model, itemsize, out_isz, use_scratch):
    """Rough VMEM footprint: double-buffered pipelined tiles + f32 intermediates."""
    x_tiles = 2 * tm * d_model * itemsize
    out_tiles = 2 * tm * d_model * out_isz
    w_tiles = 2 * (d_model * tk * itemsize + tk * d_model * itemsize + tk * 4)
    b2_tiles = 2 * d_model * 4
    h_tmp = tm * tk * (4 + itemsize)                 # f32 h + downcast copy
    acc = tm * d_model * 4 if use_scratch else 0
    return x_tiles + out_tiles + w_tiles + b2_tiles + h_tmp + acc


# ---------------------------- wrapper -----------------------------------------

def feed_forward_network(x, w1, b1, w2, b2, *, tm=None, tk=512,
                         compute_dtype=jnp.bfloat16, weights_resident=None):
    """x: [B, S, d_model]; w1: [d_model, d_ff]; b1: [d_ff];
       w2: [d_ff, d_model]; b2: [d_model].
       compute_dtype: matmul-operand dtype (default bf16; accumulation, bias add
       and ReLU stay in f32). Pass jnp.float32 for bit-faithful f32 compute."""
    B, S, d_model = x.shape
    d_ff = w1.shape[1]
    M = B * S
    out_dtype = x.dtype
    out_isz = jnp.dtype(out_dtype).itemsize

    if compute_dtype is not None:
        x = x.astype(compute_dtype)
        w1 = w1.astype(compute_dtype)
        w2 = w2.astype(compute_dtype)
    b1 = b1.astype(jnp.float32)
    b2 = b2.astype(jnp.float32)

    itemsize = jnp.dtype(x.dtype).itemsize
    pack = 8 * max(1, 4 // itemsize)          # sublane packing: f32->8, bf16->16
    use_scratch = out_dtype != jnp.float32    # f32 outputs accumulate in-place

    budget = _vmem_budget_bytes()

    # Row-tile default sized for the weight re-stream roofline of each generation:
    # v5e/v6e (>=100 MiB budget) -> tm=1024 bf16 / 512 f32; v7x (~51 MiB) -> 512 / 256.
    if tm is None:
        if itemsize <= 2:
            tm = 1024 if budget >= 80 * 1024 * 1024 else 512
        else:
            tm = 512 if budget >= 80 * 1024 * 1024 else 256
    tm_eff = max(pack, min(_round_up(tm, pack), _round_up(M, pack)))

    # Weights-resident fast path: whole W1/W2 (+ intermediates) fit the budget,
    # so they are DMA'd once (constant block index) and only x/out tiles stream.
    if weights_resident is None:
        weights_resident = (
            _est_vmem_bytes(tm_eff, d_ff, d_model, itemsize, out_isz, use_scratch)
            <= budget)

    if weights_resident:
        tk_eff = d_ff
        d_ff_p = d_ff
    else:
        tk_eff = min(tk, _round_up(d_ff, 128))
        d_ff_p = _round_up(d_ff, tk_eff)      # zero-pad d_ff: relu(0+0)@0 == 0

    # Shrink tm until the tiles fit the VMEM budget.
    while (tm_eff > pack and
           _est_vmem_bytes(tm_eff, tk_eff, d_model, itemsize, out_isz,
                           use_scratch) > budget):
        tm_eff = max(pack, _round_up(tm_eff // 2, pack))

    if d_ff_p != d_ff:
        padn = d_ff_p - d_ff
        w1 = jnp.pad(w1, ((0, 0), (0, padn)))
        b1 = jnp.pad(b1, ((0, padn),))
        w2 = jnp.pad(w2, ((0, padn), (0, 0)))

    x2d = x.reshape(M, d_model)               # no row padding: ragged last tile
    b1_2d = b1.reshape(1, d_ff_p)             # is masked by the grid boundary.
    b2_2d = b2.reshape(1, d_model)

    n_row_tiles = pl.cdiv(M, tm_eff)
    grid = (n_row_tiles, d_ff_p // tk_eff)

    w_stream = 1 if weights_resident else n_row_tiles
    cost = pl.CostEstimate(
        flops=4 * M * d_model * d_ff_p,
        transcendentals=0,
        bytes_accessed=int(
            M * d_model * itemsize
            + w_stream * (w1.size * itemsize + w2.size * itemsize + b1.size * 4)
            + b2.size * 4
            + M * d_model * out_isz),
    )

    kernel = _ffn_kernel_scratch if use_scratch else _ffn_kernel_acc_in_out
    scratch_shapes = ([pltpu.VMEM((tm_eff, d_model), jnp.float32)]
                      if use_scratch else [])

    out2d = pl.pallas_call(
        kernel,
        out_shape=jax.ShapeDtypeStruct((M, d_model), out_dtype),
        grid_spec=pltpu.PrefetchScalarGridSpec(
            num_scalar_prefetch=0,
            grid=grid,
            in_specs=[
                pl.BlockSpec((tm_eff, d_model), lambda i, k: (i, 0)),   # x row tile
                pl.BlockSpec((d_model, tk_eff), lambda i, k: (0, k)),   # W1 k-tile
                pl.BlockSpec((1, tk_eff), lambda i, k: (0, k)),         # b1 k-tile
                pl.BlockSpec((tk_eff, d_model), lambda i, k: (k, 0)),   # W2 k-tile
                pl.BlockSpec((1, d_model), lambda i, k: (0, 0)),        # b2
            ],
            out_specs=pl.BlockSpec((tm_eff, d_model), lambda i, k: (i, 0)),
            scratch_shapes=scratch_shapes,
        ),
        compiler_params=pltpu.CompilerParams(
            dimension_semantics=("parallel", "arbitrary"),
            vmem_limit_bytes=budget,
        ),
        cost_estimate=cost,
    )(x2d, w1, b1_2d, w2, b2_2d)

    return out2d.reshape(B, S, d_model)


# ---------------------------- init + test -------------------------------------

def init_params(key, d_model, d_ff, dtype=jnp.float32):
    """Deterministic init mimicking torch.nn.Linear default:
       weight/bias ~ U(-1/sqrt(in_features), 1/sqrt(in_features)).
       Stored in (in, out) layout so the kernel does x @ W + b."""
    k1, k2, k3, k4 = jax.random.split(key, 4)
    bound1 = 1.0 / jnp.sqrt(d_model)
    bound2 = 1.0 / jnp.sqrt(d_ff)
    w1 = jax.random.uniform(k1, (d_model, d_ff), dtype, -bound1, bound1)
    b1 = jax.random.uniform(k2, (d_ff,), dtype, -bound1, bound1)
    w2 = jax.random.uniform(k3, (d_ff, d_model), dtype, -bound2, bound2)
    b2 = jax.random.uniform(k4, (d_model,), dtype, -bound2, bound2)
    return w1, b1, w2, b2


if __name__ == "__main__":
    key = jax.random.PRNGKey(0)
    kx, kp = jax.random.split(key)

    batch, seq, d_model, d_ff = 2, 8, 32, 64
    x = jax.random.normal(kx, (batch, seq, d_model), dtype=jnp.float32)
    w1, b1, w2, b2 = init_params(kp, d_model, d_ff)
    ref = jnp.maximum(x @ w1 + b1, 0.0) @ w2 + b2

    # 1) Default path: bf16 compute, weights-resident, accumulate-in-output (f32 out).
    out = jax.block_until_ready(feed_forward_network(x, w1, b1, w2, b2))
    assert out.shape == (batch, seq, d_model)
    assert jnp.allclose(out, ref, atol=5e-2, rtol=5e-2)

    # 2) f32 compute, forced k-tiling + ragged row tile (M=21 not a multiple of tm).
    x2 = jax.random.normal(kx, (3, 7, d_model), dtype=jnp.float32)
    ref2 = jnp.maximum(x2 @ w1 + b1, 0.0) @ w2 + b2
    out2 = jax.block_until_ready(
        feed_forward_network(x2, w1, b1, w2, b2, tm=16, tk=32,
                             compute_dtype=jnp.float32, weights_resident=False))
    assert jnp.allclose(out2, ref2, atol=1e-5, rtol=1e-5)

    # 3) bf16 output (scratch-accumulator kernel) + k-tiling + ragged rows.
    x3 = x2.astype(jnp.bfloat16)
    out3 = jax.block_until_ready(
        feed_forward_network(x3, w1, b1, w2, b2, tm=16, tk=32,
                             weights_resident=False))
    assert out3.dtype == jnp.bfloat16
    assert jnp.allclose(out3.astype(jnp.float32), ref2, atol=6e-2, rtol=6e-2)

    print("KERNEL_OK")
</pallas_src>

<mosaic_0001>
module attributes {stable_mosaic.version = 11 : i64} {
  func.func @_ffn_kernel_acc_in_out(%arg0: i32, %arg1: i32, %arg2: memref<16x32xbf16, #tpu.memory_space<vmem>>, %arg3: memref<32x64xbf16, #tpu.memory_space<vmem>>, %arg4: memref<1x64xf32, #tpu.memory_space<vmem>>, %arg5: memref<64x32xbf16, #tpu.memory_space<vmem>>, %arg6: memref<1x32xf32, #tpu.memory_space<vmem>>, %arg7: memref<16x32xf32, #tpu.memory_space<vmem>>) attributes {dimension_semantics = [#tpu.dimension_semantics<parallel>, #tpu.dimension_semantics<arbitrary>], iteration_bounds = array<i64: 1, 1>, scalar_prefetch = 0 : i64, scratch_operands = 0 : i64, tpu.core_type = #tpu.core_type<tc>, window_params = [{transform_indices = @transform_0, window_bounds = array<i64: 16, 32>}, {transform_indices = @transform_1, window_bounds = array<i64: 32, 64>}, {transform_indices = @transform_2, window_bounds = array<i64: 1, 64>}, {transform_indices = @transform_3, window_bounds = array<i64: 64, 32>}, {pipeline_mode = #tpu.pipeline_mode<synchronous>, transform_indices = @transform_4, window_bounds = array<i64: 1, 32>}, {transform_indices = @transform_5, window_bounds = array<i64: 16, 32>}]} {
    %c0_i32 = arith.constant 0 : i32
    %0 = arith.cmpi eq, %arg1, %c0_i32 : i32
    %1 = arith.extui %0 : i1 to i32
    %c0_i32_0 = arith.constant 0 : i32
    %2 = arith.cmpi ne, %1, %c0_i32_0 : i32
    scf.if %2 {
      %cst_16 = arith.constant 0.000000e+00 : f32
      %20 = vector.broadcast %cst_16 : f32 to vector<16x32xf32>
      %c0_17 = arith.constant 0 : index
      %c0_18 = arith.constant 0 : index
      %21 = vector.load %arg7[%c0_17, %c0_18] : memref<16x32xf32, #tpu.memory_space<vmem>>, vector<16x32xf32>
      tpu.vector_store %arg7[%c0_17, %c0_18], %20 {strides = array<i32>} : memref<16x32xf32, #tpu.memory_space<vmem>>, vector<16x32xf32>,
    } else {
    }
    %c0 = arith.constant 0 : index
    %c0_1 = arith.constant 0 : index
    %3 = vector.load %arg2[%c0, %c0_1] : memref<16x32xbf16, #tpu.memory_space<vmem>>, vector<16x32xbf16>
    %c0_2 = arith.constant 0 : index
    %c0_3 = arith.constant 0 : index
    %4 = vector.load %arg3[%c0_2, %c0_3] : memref<32x64xbf16, #tpu.memory_space<vmem>>, vector<32x64xbf16>
    %cst = arith.constant dense<0.000000e+00> : vector<16x64xf32>
    %5 = tpu.matmul %3, %4, %cst {dimension_numbers = #tpu.dot_dimension_numbers<[1], [0], [0], [1], [0, 0, 1, 1], [], []>} : vector<16x32xbf16>, vector<32x64xbf16>, vector<16x64xf32> -> vector<16x64xf32>
    %c0_4 = arith.constant 0 : index
    %c0_5 = arith.constant 0 : index
    %6 = vector.load %arg4[%c0_4, %c0_5] : memref<1x64xf32, #tpu.memory_space<vmem>>, vector<1x64xf32>
    %7 = vector.broadcast %6 : vector<1x64xf32> to vector<16x64xf32>
    %8 = arith.addf %5, %7 : vector<16x64xf32>
    %cst_6 = arith.constant 0.000000e+00 : f32
    %9 = vector.broadcast %cst_6 : f32 to vector<16x64xf32>
    %10 = arith.maximumf %8, %9 : vector<16x64xf32>
    %c0_7 = arith.constant 0 : index
    %c0_8 = arith.constant 0 : index
    %11 = vector.load %arg7[%c0_7, %c0_8] : memref<16x32xf32, #tpu.memory_space<vmem>>, vector<16x32xf32>
    %12 = arith.truncf %10 : vector<16x64xf32> to vector<16x64xbf16>
    %c0_9 = arith.constant 0 : index
    %c0_10 = arith.constant 0 : index
    %13 = vector.load %arg5[%c0_9, %c0_10] : memref<64x32xbf16, #tpu.memory_space<vmem>>, vector<64x32xbf16>
    %cst_11 = arith.constant dense<0.000000e+00> : vector<16x32xf32>
    %14 = tpu.matmul %12, %13, %cst_11 {dimension_numbers = #tpu.dot_dimension_numbers<[1], [0], [0], [1], [0, 0, 1, 1], [], []>} : vector<16x64xbf16>, vector<64x32xbf16>, vector<16x32xf32> -> vector<16x32xf32>
    %15 = arith.addf %11, %14 : vector<16x32xf32>
    %c0_12 = arith.constant 0 : index
    %c0_13 = arith.constant 0 : index
    %16 = vector.load %arg7[%c0_12, %c0_13] : memref<16x32xf32, #tpu.memory_space<vmem>>, vector<16x32xf32>
    tpu.vector_store %arg7[%c0_12, %c0_13], %15 {strides = array<i32>} : memref<16x32xf32, #tpu.memory_space<vmem>>, vector<16x32xf32>,
    %c0_i32_14 = arith.constant 0 : i32
    %17 = arith.cmpi eq, %arg1, %c0_i32_14 : i32
    %18 = arith.extui %17 : i1 to i32
    %c0_i32_15 = arith.constant 0 : i32
    %19 = arith.cmpi ne, %18, %c0_i32_15 : i32
    scf.if %19 {
      %c0_16 = arith.constant 0 : index
      %c0_17 = arith.constant 0 : index
      %20 = vector.load %arg7[%c0_16, %c0_17] : memref<16x32xf32, #tpu.memory_space<vmem>>, vector<16x32xf32>
      %c0_18 = arith.constant 0 : index
      %c0_19 = arith.constant 0 : index
      %21 = vector.load %arg6[%c0_18, %c0_19] : memref<1x32xf32, #tpu.memory_space<vmem>>, vector<1x32xf32>
      %22 = vector.broadcast %21 : vector<1x32xf32> to vector<16x32xf32>
      %23 = arith.addf %20, %22 : vector<16x32xf32>
      %c0_20 = arith.constant 0 : index
      %c0_21 = arith.constant 0 : index
      %24 = vector.load %arg7[%c0_20, %c0_21] : memref<16x32xf32, #tpu.memory_space<vmem>>, vector<16x32xf32>
      tpu.vector_store %arg7[%c0_20, %c0_21], %23 {strides = array<i32>} : memref<16x32xf32, #tpu.memory_space<vmem>>, vector<16x32xf32>,
    } else {
    }
    return
  }
  func.func @transform_0(%arg0: i32, %arg1: i32) -> (i32, i32) {
    %c0_i32 = arith.constant 0 : i32
    %c0_i32_0 = arith.constant 0 : i32
    return %arg0, %c0_i32 : i32, i32
  }
  func.func @transform_1(%arg0: i32, %arg1: i32) -> (i32, i32) {
    %c0_i32 = arith.constant 0 : i32
    %c0_i32_0 = arith.constant 0 : i32
    return %c0_i32, %arg1 : i32, i32
  }
  func.func @transform_2(%arg0: i32, %arg1: i32) -> (i32, i32) {
    %c0_i32 = arith.constant 0 : i32
    %c0_i32_0 = arith.constant 0 : i32
    return %c0_i32, %arg1 : i32, i32
  }
  func.func @transform_3(%arg0: i32, %arg1: i32) -> (i32, i32) {
    %c0_i32 = arith.constant 0 : i32
    %c0_i32_0 = arith.constant 0 : i32
    return %arg1, %c0_i32 : i32, i32
  }
  func.func @transform_4(%arg0: i32, %arg1: i32) -> (i32, i32) {
    %c0_i32 = arith.constant 0 : i32
    %c0_i32_0 = arith.constant 0 : i32
    %c0_i32_1 = arith.constant 0 : i32
    return %c0_i32, %c0_i32_0 : i32, i32
  }
  func.func @transform_5(%arg0: i32, %arg1: i32) -> (i32, i32) {
    %c0_i32 = arith.constant 0 : i32
    %c0_i32_0 = arith.constant 0 : i32
    return %arg0, %c0_i32 : i32, i32
  }
}

</mosaic_0001>

<bundles_post_ra>
// kernel: tpu_custom_call.1
= control target key start
LH: loop header
LB: loop body
LE: loop exit
PB: predicated region body
PF: predicated region fallthrough
CT: control target
= control target key end

     0   :  { %s304_s0 = inlined_call_operand.vmem [shape: bf16[16,32], index: 0, kind: input, shape index: {}]   ;;  %s305_s1 = inlined_call_operand.vmem [shape: bf16[32,64], index: 1, kind: input, shape index: {}]   ;;  %s306_s2 = inlined_call_operand.vmem [shape: f32[1,64], index: 2, kind: input, shape index: {}]   ;;  %s307_s3 = inlined_call_operand.vmem [shape: bf16[64,32], index: 3, kind: input, shape index: {}]   ;;  %s308_s4 = inlined_call_operand.vmem [shape: f32[1,32], index: 4, kind: input, shape index: {}]   ;;  %s309_s5 = inlined_call_operand.hbm [shape: f32[16,32], index: 5, kind: output, shape index: {}]  }
   0x1   :  { %v196_v0 = vld [vmem:[%s305_s1 + $0x8] sm:$0xff]  ;;  %v195_v1 = vld [vmem:[%s305_s1] sm:$0xff] }
   0x2   :  { %66 = vmatpush.bf16.msra.mxu0 %v196_v0 }
   0x3   :  { %10 = vsyncpa [#allocation3], 0  ;;  %v194_v2 = vld [vmem:[%s304_s0] sm:$0xff]  ;;  %vm26_vm0 = vcmask 261120   ;;  %v200_v3 = vld [vmem:[%s307_s3 + $0x18] sm:$0xff]  ;;  %v233_v7 = vmov 0.0  }
   0x4   :  { %119 = vmatpush.bf16.msra.mxu1 %v200_v3  ;;  %v199_v4 = vld [vmem:[%s307_s3 + $0x10] sm:$0xff]  ;;  %v198_v5 = vld [vmem:[%s307_s3 + $0x8] sm:$0xff]  ;;  %v197_v6 = vld [vmem:[%s307_s3] sm:$0xff]  ;;  %27 = vst.msk [vmem:[#allocation2] sm:$0xff] %vm26_vm0, %v233_v7  ;;  %vm111_vm1 = vcmask 523264   ;;  %s152_s11 = sshll.u32 %s309_s5, 4  ;;  %s153_s11 = int_to_ptr.hbm [resolvable:$true] %s152_s11 }
   0x5   :  { %28 = vst.msk [vmem:[#allocation2 + $0x8] sm:$0xff] %vm26_vm0, %v233_v7  ;;  %v205_v9 = vld [vmem:[%s306_s2] ss:$0 sm:$0xff]  ;;  %s234_s2 = smov [#allocation2]   ;;  %s236_s12 = smov 8  }
   0x6   :  { %67 = vmatpush.bf16.msra.mxu0 %v195_v1  ;;  %v206_v20 = vld [vmem:[%s308_s4] ss:$0 sm:$0xff]  ;;  %s150_s8 = sshll.u32 %s234_s2, 4  ;;  %s235_s4 = smov 128   ;;  %s151_s8 = int_to_ptr.vmem [resolvable:$true] %s150_s8 }
   0x8   :  { %120 = vmatpush.bf16.msra.mxu1 %v199_v4 }
   0x9   :  { %176 = vmatmul.msk.bf16.vlgmr.msra.gmra.mxu0 %vm26_vm0, %v194_v2 }
   0xb   :  { %v76_v16 = vld [vmem:[#allocation2] sm:$0xff] }
   0xc   :  { %121 = vmatpush.bf16.msra.mxu1 %v198_v5  ;;  %v77_v19 = vld [vmem:[#allocation2 + $0x8] sm:$0xff] }
  0x10   :  { %122 = vmatpush.bf16.msra.mxu1 %v197_v6 }
  0x86   :  { %v69_v8 = vpop.f32.mrf.mxu0 }
  0x87   :  { %v70_v10 = vadd.f32 %v205_v9, %v69_v8 }
  0x89   :  { %v74_v13 = vmax.f32 %v70_v10, 0.0 }
  0x8e   :  { %v71_v11 = vpop.f32.mrf.mxu0 }
  0x8f   :  { %v72_v12 = vadd.f32 %v205_v9, %v71_v11 }
  0x91   :  { %v75_v14 = vmax.f32 %v72_v12, 0.0 }
  0x93   :  { %v78_v15 = vpack.c.bf16 %v75_v14, %v74_v13 }
  0x95   :  { %193 = vmatmul.msk.bf16.vlgmr.msra.gmra.mxu1 %vm111_vm1, %v78_v15 }
 0x112   :  { %v124_v17 = vpop.f32.mrf.mxu1 }
 0x113   :  { %v129_v18 = vadd.f32 %v124_v17, %v76_v16 }
 0x115   :  { %131 = vst.msk [vmem:[#allocation2] sm:$0xff] %vm26_vm0, %v129_v18 }
 0x11a   :  { %v126_v21 = vpop.f32.mrf.mxu1 }
 0x11b   :  { %v130_v22 = vadd.f32 %v126_v21, %v77_v19 }
 0x11c   :  { %v136_v23 = vld [vmem:[#allocation2] sm:$0xff] }
 0x11d   :  { %v142_v24 = vadd.f32 %v206_v20, %v136_v23  ;;  %132 = vst.msk [vmem:[#allocation2 + $0x8] sm:$0xff] %vm26_vm0, %v130_v22 }
 0x11f   :  { %144 = vst.msk [vmem:[#allocation2] sm:$0xff] %vm26_vm0, %v142_v24 }
 0x124   :  { %v137_v25 = vld [vmem:[#allocation2 + $0x8] sm:$0xff] }
 0x125   :  { %v143_v26 = vadd.f32 %v206_v20, %v137_v25 }
 0x127   :  { %145 = vst.msk [vmem:[#allocation2 + $0x8] sm:$0xff] %vm26_vm0, %v143_v26 }
 0x128   :  { %158 = dma.vmem_to_hbm [thread:$0]  %s151_s8, 256, %s153_s11, [#allocation3], %s235_s4, %s235_s4, %s236_s12  }
 0x129   :  { %231 = dma.done.wait [#allocation3], 256  }
 0x12a   :  { %232 = vsyncadd [#allocation3], 4294967040 }
 0x12b   :  { %163 = vsyncpa [#allocation3], 1 }

</bundles_post_ra>
